<compile_context>
chip_gen: v7x
topology: tpu7x:2x2x1
jax: 0.10.0
libtpu: 0.0.40
codegen_flags: <defaults>
</compile_context>

<pallas_src>
import functools

import jax
import jax.numpy as jnp
import numpy as np
from jax import lax
from jax.experimental import pallas as pl
from jax.experimental.pallas import tpu as pltpu

T_ITERS = 5
NORM_GROUPS = 2
EPS = 1e-5
_LANE = 128


# ----------------------------- in-kernel helpers -----------------------------

def _split_bf16(x_f32):
    """Two-term bf16 split: x ~= hi + lo (residual ~2^-16 relative)."""
    hi = x_f32.astype(jnp.bfloat16)
    lo = (x_f32 - hi.astype(jnp.float32)).astype(jnp.bfloat16)
    return hi, lo


def _dot_nt(a, b):
    # a (m, k) @ b(n, k)^T -> (m, n), f32 accumulation, transpose-free form.
    return lax.dot_general(a, b, (((1,), (1,)), ((), ())),
                           preferred_element_type=jnp.float32)


def _dot_nn(a, b):
    return lax.dot_general(a, b, (((1,), (0,)), ((), ())),
                           preferred_element_type=jnp.float32)


def _gram_bf16(x_f32):
    """x @ x^T with f32 accumulation using hi/lo bf16 operands on the MXU.
    (Dropping the lo@lo^T term keeps ~2^-16 relative accuracy.)"""
    hi, lo = _split_bf16(x_f32)
    # Note: lo@hi^T == (hi@lo^T)^T; computed explicitly to avoid a sub-tile
    # (C,C) transpose relayout -- one extra bf16 pass, zero lowering risk.
    return _dot_nt(hi, hi) + _dot_nt(hi, lo) + _dot_nt(lo, hi)


def _mm_bf16(a_f32, b_hi, b_lo):
    """a @ (b_hi + b_lo) with a split into hi/lo as well; f32 accumulation."""
    a_hi, a_lo = _split_bf16(a_f32)
    return _dot_nn(a_hi, b_hi) + _dot_nn(a_hi, b_lo) + _dot_nn(a_lo, b_hi)


def _newton_schulz(S, t_iters):
    # Small (C,C) serial chain -- kept in f32 (MXU latency-bound, not FLOP-bound).
    C = S.shape[-1]
    B = jnp.eye(C, dtype=jnp.float32)
    for _ in range(t_iters):
        B3 = _dot_nn(_dot_nn(B, B), B)
        B = 1.5 * B - 0.5 * _dot_nn(B3, S)
    return B


# ------------------------ path 1: whole-slab per group ------------------------

def _oni_small_kernel(z_ref, w_ref, *, t_iters, eps):
    # z_ref, w_ref: (C, D) -- one group per grid step (G is the grid axis).
    Z = z_ref[...].astype(jnp.float32)
    C, D = Z.shape

    mean = jnp.sum(Z, axis=-1, keepdims=True) * (1.0 / D)
    Zc = Z - mean

    S = _gram_bf16(Zc) + eps * jnp.eye(C, dtype=jnp.float32)
    # Frobenius normalization: rsqrt on the EUP + multiplies, no divides.
    inv_norm = lax.rsqrt(jnp.sum(S * S, axis=(0, 1), keepdims=True))
    S = S * inv_norm

    B = _newton_schulz(S, t_iters)
    # Fold the final 1/sqrt(norm_S) scale into the small (C,C) matrix.
    B = B * jnp.sqrt(inv_norm)

    zc_hi, zc_lo = _split_bf16(Zc)
    W = _mm_bf16(B, zc_hi, zc_lo)
    w_ref[...] = W.astype(w_ref.dtype)


# --------------------- path 2: D-tiled streaming (2 passes) -------------------

def _oni_stats_kernel(z_ref, b_ref, bm_ref, *, d_true, d_block, t_iters, eps):
    # z_ref: (C, TD) tile of Z.  b_ref (C, C) / bm_ref (C, 1): resident f32
    # output blocks used directly as accumulators across the D axis.
    d = pl.program_id(1)
    nd = pl.num_programs(1)

    Z = z_ref[...].astype(jnp.float32)
    C, TD = Z.shape

    if d_true % d_block != 0:
        # Ragged last tile only (static check): zero the overhang lanes so they
        # cannot pollute the Gram / row-sum accumulation.  (1, TD) iota, cheap.
        lane = lax.broadcasted_iota(jnp.int32, (1, TD), 1) + d * d_block
        Z = jnp.where(lane < d_true, Z, 0.0)

    @pl.when(d == 0)
    def _():
        b_ref[...] = jnp.zeros_like(b_ref)
        bm_ref[...] = jnp.zeros_like(bm_ref)

    b_ref[...] += _gram_bf16(Z)                              # += Z_tile @ Z_tile^T
    bm_ref[...] += jnp.sum(Z, axis=-1, keepdims=True)        # += row sums

    @pl.when(d == nd - 1)
    def _():
        zz = b_ref[...]
        rowsum = bm_ref[...]
        mean = rowsum * (1.0 / d_true)
        # Zc Zc^T = Z Z^T - rowsum rowsum^T / D
        S = zz - _dot_nt(rowsum, rowsum) * (1.0 / d_true)
        S = S + eps * jnp.eye(C, dtype=jnp.float32)
        inv_norm = lax.rsqrt(jnp.sum(S * S, axis=(0, 1), keepdims=True))
        S = S * inv_norm
        B = _newton_schulz(S, t_iters)
        B = B * jnp.sqrt(inv_norm)            # fold 1/sqrt(norm_S) into B
        b_ref[...] = B
        bm_ref[...] = _dot_nn(B, mean)        # B @ mean, reused for every D tile


def _oni_apply_kernel(b_ref, bm_ref, z_ref, w_ref):
    # W_tile = B @ Z_tile - (B @ mean) 1^T  ( == B @ Zc_tile, already scaled).
    Z = z_ref[...].astype(jnp.float32)
    z_hi, z_lo = _split_bf16(Z)
    W = _mm_bf16(b_ref[...], z_hi, z_lo) - bm_ref[...]
    w_ref[...] = W.astype(w_ref.dtype)
    # Overhang lanes of a ragged last tile compute garbage but the out-of-bounds
    # region of the output block is dropped on writeback.


# ----------------------------------- wrapper ----------------------------------

def _vmem_budget_bytes():
    """~3/4 of physical VMEM, capped at 100 MiB (v5e/v6e: ~96 MiB, v7x: 48 MiB)."""
    try:
        cap = int(pltpu.get_tpu_info().vmem_capacity_bytes)
    except Exception:
        cap = 64 * 1024 * 1024
    return max(min(cap * 3 // 4, 100 * 1024 * 1024), 32 * 1024 * 1024)


def oni_norm(weight: jax.Array, norm_groups: int = NORM_GROUPS,
             T: int = T_ITERS, eps: float = EPS, *, d_block=None) -> jax.Array:
    """Pallas implementation of ONINorm.forward(weight)."""
    O = weight.shape[0]
    assert O % norm_groups == 0
    G = norm_groups
    C = O // G
    D = int(np.prod(weight.shape[1:]))

    # No host-side pad/slice: the (G, C, D) view is fed directly; block shapes
    # equal the full (C, D) dims so no masking is needed in the small path.
    Z = weight.reshape(G, C, D)
    vmem_limit = _vmem_budget_bytes()
    slab_bytes = C * D * 4

    if d_block is None and 12 * slab_bytes <= vmem_limit:
        # ---- whole-slab path: one group per grid step, G split across TCs ----
        kernel = functools.partial(_oni_small_kernel, t_iters=T, eps=eps)
        W = pl.pallas_call(
            kernel,
            out_shape=jax.ShapeDtypeStruct((G, C, D), weight.dtype),
            grid=(G,),
            in_specs=[pl.BlockSpec((None, C, D), lambda g: (g, 0, 0))],
            out_specs=pl.BlockSpec((None, C, D), lambda g: (g, 0, 0)),
            compiler_params=pltpu.CompilerParams(
                dimension_semantics=("parallel",),
                vmem_limit_bytes=vmem_limit,
            ),
        )(Z)
        return W.reshape(weight.shape)

    # ---- D-tiled streaming path (large D / v7x's 64 MiB VMEM) ----
    if d_block is None:
        # ~4 double-buffered (C, TD) f32 blocks + live temps inside 1/3 budget.
        per_lane_bytes = C * 4 * 8
        d_block = max(_LANE, (vmem_limit // 3 // per_lane_bytes) // _LANE * _LANE)
        d_block = min(d_block, pl.cdiv(D, _LANE) * _LANE)
    assert d_block % _LANE == 0
    nd = pl.cdiv(D, d_block)

    stats_kernel = functools.partial(_oni_stats_kernel, d_true=D,
                                     d_block=d_block, t_iters=T, eps=eps)
    Bmat, Bmean = pl.pallas_call(
        stats_kernel,
        out_shape=(jax.ShapeDtypeStruct((G, C, C), jnp.float32),
                   jax.ShapeDtypeStruct((G, C, 1), jnp.float32)),
        grid=(G, nd),
        in_specs=[pl.BlockSpec((None, C, d_block), lambda g, d: (g, 0, d))],
        out_specs=[pl.BlockSpec((None, C, C), lambda g, d: (g, 0, 0)),
                   pl.BlockSpec((None, C, 1), lambda g, d: (g, 0, 0))],
        compiler_params=pltpu.CompilerParams(
            dimension_semantics=("parallel", "arbitrary"),
            vmem_limit_bytes=vmem_limit,
        ),
    )(Z)

    W = pl.pallas_call(
        _oni_apply_kernel,
        out_shape=jax.ShapeDtypeStruct((G, C, D), weight.dtype),
        grid=(G, nd),
        in_specs=[pl.BlockSpec((None, C, C), lambda g, d: (g, 0, 0)),
                  pl.BlockSpec((None, C, 1), lambda g, d: (g, 0, 0)),
                  pl.BlockSpec((None, C, d_block), lambda g, d: (g, 0, d))],
        out_specs=pl.BlockSpec((None, C, d_block), lambda g, d: (g, 0, d)),
        compiler_params=pltpu.CompilerParams(
            dimension_semantics=("parallel", "parallel"),
            vmem_limit_bytes=vmem_limit,
        ),
    )(Bmat, Bmean, Z)
    return W.reshape(weight.shape)


# --------------------------------- reference ----------------------------------

def _oni_norm_ref(weight: np.ndarray, norm_groups: int = NORM_GROUPS,
                  T: int = T_ITERS, eps: float = EPS) -> np.ndarray:
    """Pure-numpy f64 reference mirroring the PyTorch forward."""
    G = norm_groups
    Z = weight.reshape(G, weight.shape[0] // G, -1).astype(np.float64)
    Zc = Z - Z.mean(axis=-1, keepdims=True)
    S = Zc @ np.transpose(Zc, (0, 2, 1))
    eye = np.eye(S.shape[-1])[None]
    S = S + eps * eye
    norm_S = np.sqrt((S * S).sum(axis=(1, 2), keepdims=True))
    S = S / norm_S
    B = np.broadcast_to(np.eye(S.shape[-1]), S.shape).copy()
    for _ in range(T):
        B = 1.5 * B - 0.5 * ((B @ B @ B) @ S)
    W = (B @ Zc) / np.sqrt(norm_S)
    return W.reshape(weight.shape)


if __name__ == "__main__":
    key = jax.random.PRNGKey(0)
    k1, k2 = jax.random.split(key)

    # Small conv weight (O=8, I=4, kH=kW=3): exercises the whole-slab path.
    w_small = jax.random.normal(k1, (8, 4, 3, 3), dtype=jnp.float32)
    out_small = jax.block_until_ready(oni_norm(w_small, norm_groups=NORM_GROUPS))
    ref_small = _oni_norm_ref(np.asarray(w_small), norm_groups=NORM_GROUPS)
    np.testing.assert_allclose(np.asarray(out_small), ref_small,
                               rtol=1e-4, atol=1e-4)

    # Wider weight with a forced 128-lane D tile: exercises the D-tiled
    # streaming path (multi-tile accumulation + ragged last tile).
    w_wide = jax.random.normal(k2, (8, 32, 3, 3), dtype=jnp.float32)
    out_wide = jax.block_until_ready(
        oni_norm(w_wide, norm_groups=NORM_GROUPS, d_block=128))
    ref_wide = _oni_norm_ref(np.asarray(w_wide), norm_groups=NORM_GROUPS)
    np.testing.assert_allclose(np.asarray(out_wide), ref_wide,
                               rtol=1e-4, atol=1e-4)

    print("KERNEL_OK")
</pallas_src>

<mosaic_0001>
module attributes {stable_mosaic.version = 11 : i64} {
  func.func @_oni_small_kernel(%arg0: i32, %arg1: memref<1x4x36xf32, #tpu.memory_space<vmem>>, %arg2: memref<1x4x36xf32, #tpu.memory_space<vmem>>) attributes {dimension_semantics = [#tpu.dimension_semantics<parallel>], iteration_bounds = array<i64: 2>, scalar_prefetch = 0 : i64, scratch_operands = 0 : i64, tpu.core_type = #tpu.core_type<tc>, window_params = [{transform_indices = @transform_0, window_bounds = array<i64: 1, 4, 36>}, {transform_indices = @transform_1, window_bounds = array<i64: 1, 4, 36>}]} {
    %c0 = arith.constant 0 : index
    %c0_0 = arith.constant 0 : index
    %c0_1 = arith.constant 0 : index
    %0 = vector.load %arg1[%c0, %c0_0, %c0_1] : memref<1x4x36xf32, #tpu.memory_space<vmem>>, vector<1x4x36xf32>
    %1 = vector.shape_cast %0 : vector<1x4x36xf32> to vector<4x36xf32>
    %cst = arith.constant dense<0.000000e+00> : vector<4xf32>
    %2 = vector.multi_reduction <add>, %1, %cst [1] : vector<4x36xf32> to vector<4xf32>
    %3 = vector.shape_cast %2 : vector<4xf32> to vector<4x1xf32>
    %cst_2 = arith.constant 0.027777778 : f32
    %4 = vector.broadcast %cst_2 : f32 to vector<4x1xf32>
    %5 = arith.mulf %3, %4 : vector<4x1xf32>
    %6 = vector.broadcast %5 : vector<4x1xf32> to vector<4x36xf32>
    %7 = arith.subf %1, %6 : vector<4x36xf32>
    %8 = arith.truncf %7 : vector<4x36xf32> to vector<4x36xbf16>
    %9 = arith.extf %8 : vector<4x36xbf16> to vector<4x36xf32>
    %10 = arith.subf %7, %9 : vector<4x36xf32>
    %11 = arith.truncf %10 : vector<4x36xf32> to vector<4x36xbf16>
    %cst_3 = arith.constant dense<0.000000e+00> : vector<4x4xf32>
    %12 = tpu.matmul %8, %8, %cst_3 {dimension_numbers = #tpu.dot_dimension_numbers<[1], [1], [0], [0], [0, 0, 1, 0], [], []>} : vector<4x36xbf16>, vector<4x36xbf16>, vector<4x4xf32> -> vector<4x4xf32>
    %cst_4 = arith.constant dense<0.000000e+00> : vector<4x4xf32>
    %13 = tpu.matmul %8, %11, %cst_4 {dimension_numbers = #tpu.dot_dimension_numbers<[1], [1], [0], [0], [0, 0, 1, 0], [], []>} : vector<4x36xbf16>, vector<4x36xbf16>, vector<4x4xf32> -> vector<4x4xf32>
    %14 = arith.addf %12, %13 : vector<4x4xf32>
    %cst_5 = arith.constant dense<0.000000e+00> : vector<4x4xf32>
    %15 = tpu.matmul %11, %8, %cst_5 {dimension_numbers = #tpu.dot_dimension_numbers<[1], [1], [0], [0], [0, 0, 1, 0], [], []>} : vector<4x36xbf16>, vector<4x36xbf16>, vector<4x4xf32> -> vector<4x4xf32>
    %16 = arith.addf %14, %15 : vector<4x4xf32>
    %17 = tpu.iota {dimensions = array<i32: 0>} : vector<4x4xi32>
    %18 = tpu.iota {dimensions = array<i32: 1>} : vector<4x4xi32>
    %c0_i32 = arith.constant 0 : i32
    %19 = vector.broadcast %c0_i32 : i32 to vector<4x4xi32>
    %20 = arith.addi %17, %19 : vector<4x4xi32>
    %21 = arith.cmpi eq, %20, %18 : vector<4x4xi32>
    %22 = arith.extui %21 : vector<4x4xi1> to vector<4x4xi32>
    %23 = arith.sitofp %22 : vector<4x4xi32> to vector<4x4xf32>
    %cst_6 = arith.constant 9.99999974E-6 : f32
    %24 = vector.broadcast %cst_6 : f32 to vector<4x4xf32>
    %25 = arith.mulf %24, %23 : vector<4x4xf32>
    %26 = arith.addf %16, %25 : vector<4x4xf32>
    %27 = arith.mulf %26, %26 : vector<4x4xf32>
    %28 = vector.shape_cast %27 : vector<4x4xf32> to vector<1x4x4xf32>
    %cst_7 = arith.constant dense<0.000000e+00> : vector<1xf32>
    %29 = vector.multi_reduction <add>, %28, %cst_7 [1, 2] : vector<1x4x4xf32> to vector<1xf32>
    %30 = vector.shape_cast %29 : vector<1xf32> to vector<1x1x1xf32>
    %31 = vector.extract %30[0, 0, 0] : f32 from vector<1x1x1xf32>
    %32 = vector.broadcast %31 : f32 to vector<1x1xf32>
    %33 = math.rsqrt %32 : vector<1x1xf32>
    %34 = vector.broadcast %33 : vector<1x1xf32> to vector<4x4xf32>
    %35 = arith.mulf %26, %34 : vector<4x4xf32>
    %36 = tpu.iota {dimensions = array<i32: 0>} : vector<4x4xi32>
    %37 = tpu.iota {dimensions = array<i32: 1>} : vector<4x4xi32>
    %c0_i32_8 = arith.constant 0 : i32
    %38 = vector.broadcast %c0_i32_8 : i32 to vector<4x4xi32>
    %39 = arith.addi %36, %38 : vector<4x4xi32>
    %40 = arith.cmpi eq, %39, %37 : vector<4x4xi32>
    %41 = arith.extui %40 : vector<4x4xi1> to vector<4x4xi32>
    %42 = arith.sitofp %41 : vector<4x4xi32> to vector<4x4xf32>
    %cst_9 = arith.constant dense<0.000000e+00> : vector<4x4xf32>
    %43 = tpu.matmul %42, %42, %cst_9 {dimension_numbers = #tpu.dot_dimension_numbers<[1], [0], [0], [1], [0, 0, 1, 1], [], []>} : vector<4x4xf32>, vector<4x4xf32>, vector<4x4xf32> -> vector<4x4xf32>
    %cst_10 = arith.constant dense<0.000000e+00> : vector<4x4xf32>
    %44 = tpu.matmul %43, %42, %cst_10 {dimension_numbers = #tpu.dot_dimension_numbers<[1], [0], [0], [1], [0, 0, 1, 1], [], []>} : vector<4x4xf32>, vector<4x4xf32>, vector<4x4xf32> -> vector<4x4xf32>
    %cst_11 = arith.constant 1.500000e+00 : f32
    %45 = vector.broadcast %cst_11 : f32 to vector<4x4xf32>
    %46 = arith.mulf %45, %42 : vector<4x4xf32>
    %cst_12 = arith.constant dense<0.000000e+00> : vector<4x4xf32>
    %47 = tpu.matmul %44, %35, %cst_12 {dimension_numbers = #tpu.dot_dimension_numbers<[1], [0], [0], [1], [0, 0, 1, 1], [], []>} : vector<4x4xf32>, vector<4x4xf32>, vector<4x4xf32> -> vector<4x4xf32>
    %cst_13 = arith.constant 5.000000e-01 : f32
    %48 = vector.broadcast %cst_13 : f32 to vector<4x4xf32>
    %49 = arith.mulf %48, %47 : vector<4x4xf32>
    %50 = arith.subf %46, %49 : vector<4x4xf32>
    %cst_14 = arith.constant dense<0.000000e+00> : vector<4x4xf32>
    %51 = tpu.matmul %50, %50, %cst_14 {dimension_numbers = #tpu.dot_dimension_numbers<[1], [0], [0], [1], [0, 0, 1, 1], [], []>} : vector<4x4xf32>, vector<4x4xf32>, vector<4x4xf32> -> vector<4x4xf32>
    %cst_15 = arith.constant dense<0.000000e+00> : vector<4x4xf32>
    %52 = tpu.matmul %51, %50, %cst_15 {dimension_numbers = #tpu.dot_dimension_numbers<[1], [0], [0], [1], [0, 0, 1, 1], [], []>} : vector<4x4xf32>, vector<4x4xf32>, vector<4x4xf32> -> vector<4x4xf32>
    %cst_16 = arith.constant 1.500000e+00 : f32
    %53 = vector.broadcast %cst_16 : f32 to vector<4x4xf32>
    %54 = arith.mulf %53, %50 : vector<4x4xf32>
    %cst_17 = arith.constant dense<0.000000e+00> : vector<4x4xf32>
    %55 = tpu.matmul %52, %35, %cst_17 {dimension_numbers = #tpu.dot_dimension_numbers<[1], [0], [0], [1], [0, 0, 1, 1], [], []>} : vector<4x4xf32>, vector<4x4xf32>, vector<4x4xf32> -> vector<4x4xf32>
    %cst_18 = arith.constant 5.000000e-01 : f32
    %56 = vector.broadcast %cst_18 : f32 to vector<4x4xf32>
    %57 = arith.mulf %56, %55 : vector<4x4xf32>
    %58 = arith.subf %54, %57 : vector<4x4xf32>
    %cst_19 = arith.constant dense<0.000000e+00> : vector<4x4xf32>
    %59 = tpu.matmul %58, %58, %cst_19 {dimension_numbers = #tpu.dot_dimension_numbers<[1], [0], [0], [1], [0, 0, 1, 1], [], []>} : vector<4x4xf32>, vector<4x4xf32>, vector<4x4xf32> -> vector<4x4xf32>
    %cst_20 = arith.constant dense<0.000000e+00> : vector<4x4xf32>
    %60 = tpu.matmul %59, %58, %cst_20 {dimension_numbers = #tpu.dot_dimension_numbers<[1], [0], [0], [1], [0, 0, 1, 1], [], []>} : vector<4x4xf32>, vector<4x4xf32>, vector<4x4xf32> -> vector<4x4xf32>
    %cst_21 = arith.constant 1.500000e+00 : f32
    %61 = vector.broadcast %cst_21 : f32 to vector<4x4xf32>
    %62 = arith.mulf %61, %58 : vector<4x4xf32>
    %cst_22 = arith.constant dense<0.000000e+00> : vector<4x4xf32>
    %63 = tpu.matmul %60, %35, %cst_22 {dimension_numbers = #tpu.dot_dimension_numbers<[1], [0], [0], [1], [0, 0, 1, 1], [], []>} : vector<4x4xf32>, vector<4x4xf32>, vector<4x4xf32> -> vector<4x4xf32>
    %cst_23 = arith.constant 5.000000e-01 : f32
    %64 = vector.broadcast %cst_23 : f32 to vector<4x4xf32>
    %65 = arith.mulf %64, %63 : vector<4x4xf32>
    %66 = arith.subf %62, %65 : vector<4x4xf32>
    %cst_24 = arith.constant dense<0.000000e+00> : vector<4x4xf32>
    %67 = tpu.matmul %66, %66, %cst_24 {dimension_numbers = #tpu.dot_dimension_numbers<[1], [0], [0], [1], [0, 0, 1, 1], [], []>} : vector<4x4xf32>, vector<4x4xf32>, vector<4x4xf32> -> vector<4x4xf32>
    %cst_25 = arith.constant dense<0.000000e+00> : vector<4x4xf32>
    %68 = tpu.matmul %67, %66, %cst_25 {dimension_numbers = #tpu.dot_dimension_numbers<[1], [0], [0], [1], [0, 0, 1, 1], [], []>} : vector<4x4xf32>, vector<4x4xf32>, vector<4x4xf32> -> vector<4x4xf32>
    %cst_26 = arith.constant 1.500000e+00 : f32
    %69 = vector.broadcast %cst_26 : f32 to vector<4x4xf32>
    %70 = arith.mulf %69, %66 : vector<4x4xf32>
    %cst_27 = arith.constant dense<0.000000e+00> : vector<4x4xf32>
    %71 = tpu.matmul %68, %35, %cst_27 {dimension_numbers = #tpu.dot_dimension_numbers<[1], [0], [0], [1], [0, 0, 1, 1], [], []>} : vector<4x4xf32>, vector<4x4xf32>, vector<4x4xf32> -> vector<4x4xf32>
    %cst_28 = arith.constant 5.000000e-01 : f32
    %72 = vector.broadcast %cst_28 : f32 to vector<4x4xf32>
    %73 = arith.mulf %72, %71 : vector<4x4xf32>
    %74 = arith.subf %70, %73 : vector<4x4xf32>
    %cst_29 = arith.constant dense<0.000000e+00> : vector<4x4xf32>
    %75 = tpu.matmul %74, %74, %cst_29 {dimension_numbers = #tpu.dot_dimension_numbers<[1], [0], [0], [1], [0, 0, 1, 1], [], []>} : vector<4x4xf32>, vector<4x4xf32>, vector<4x4xf32> -> vector<4x4xf32>
    %cst_30 = arith.constant dense<0.000000e+00> : vector<4x4xf32>
    %76 = tpu.matmul %75, %74, %cst_30 {dimension_numbers = #tpu.dot_dimension_numbers<[1], [0], [0], [1], [0, 0, 1, 1], [], []>} : vector<4x4xf32>, vector<4x4xf32>, vector<4x4xf32> -> vector<4x4xf32>
    %cst_31 = arith.constant 1.500000e+00 : f32
    %77 = vector.broadcast %cst_31 : f32 to vector<4x4xf32>
    %78 = arith.mulf %77, %74 : vector<4x4xf32>
    %cst_32 = arith.constant dense<0.000000e+00> : vector<4x4xf32>
    %79 = tpu.matmul %76, %35, %cst_32 {dimension_numbers = #tpu.dot_dimension_numbers<[1], [0], [0], [1], [0, 0, 1, 1], [], []>} : vector<4x4xf32>, vector<4x4xf32>, vector<4x4xf32> -> vector<4x4xf32>
    %cst_33 = arith.constant 5.000000e-01 : f32
    %80 = vector.broadcast %cst_33 : f32 to vector<4x4xf32>
    %81 = arith.mulf %80, %79 : vector<4x4xf32>
    %82 = arith.subf %78, %81 : vector<4x4xf32>
    %83 = math.sqrt %33 : vector<1x1xf32>
    %84 = vector.broadcast %83 : vector<1x1xf32> to vector<4x4xf32>
    %85 = arith.mulf %82, %84 : vector<4x4xf32>
    %86 = arith.truncf %7 : vector<4x36xf32> to vector<4x36xbf16>
    %87 = arith.extf %86 : vector<4x36xbf16> to vector<4x36xf32>
    %88 = arith.subf %7, %87 : vector<4x36xf32>
    %89 = arith.truncf %88 : vector<4x36xf32> to vector<4x36xbf16>
    %90 = arith.truncf %85 : vector<4x4xf32> to vector<4x4xbf16>
    %91 = arith.extf %90 : vector<4x4xbf16> to vector<4x4xf32>
    %92 = arith.subf %85, %91 : vector<4x4xf32>
    %93 = arith.truncf %92 : vector<4x4xf32> to vector<4x4xbf16>
    %cst_34 = arith.constant dense<0.000000e+00> : vector<4x36xf32>
    %94 = tpu.matmul %90, %86, %cst_34 {dimension_numbers = #tpu.dot_dimension_numbers<[1], [0], [0], [1], [0, 0, 1, 1], [], []>} : vector<4x4xbf16>, vector<4x36xbf16>, vector<4x36xf32> -> vector<4x36xf32>
    %cst_35 = arith.constant dense<0.000000e+00> : vector<4x36xf32>
    %95 = tpu.matmul %90, %89, %cst_35 {dimension_numbers = #tpu.dot_dimension_numbers<[1], [0], [0], [1], [0, 0, 1, 1], [], []>} : vector<4x4xbf16>, vector<4x36xbf16>, vector<4x36xf32> -> vector<4x36xf32>
    %96 = arith.addf %94, %95 : vector<4x36xf32>
    %cst_36 = arith.constant dense<0.000000e+00> : vector<4x36xf32>
    %97 = tpu.matmul %93, %86, %cst_36 {dimension_numbers = #tpu.dot_dimension_numbers<[1], [0], [0], [1], [0, 0, 1, 1], [], []>} : vector<4x4xbf16>, vector<4x36xbf16>, vector<4x36xf32> -> vector<4x36xf32>
    %98 = arith.addf %96, %97 : vector<4x36xf32>
    %c0_37 = arith.constant 0 : index
    %c0_38 = arith.constant 0 : index
    %c0_39 = arith.constant 0 : index
    %99 = vector.load %arg2[%c0_37, %c0_38, %c0_39] : memref<1x4x36xf32, #tpu.memory_space<vmem>>, vector<1x4x36xf32>
    %100 = vector.shape_cast %99 : vector<1x4x36xf32> to vector<4x36xf32>
    %101 = vector.shape_cast %98 : vector<4x36xf32> to vector<1x4x36xf32>
    tpu.vector_store %arg2[%c0_37, %c0_38, %c0_39], %101 {strides = array<i32>} : memref<1x4x36xf32, #tpu.memory_space<vmem>>, vector<1x4x36xf32>,
    return
  }
  func.func @transform_0(%arg0: i32) -> (i32, i32, i32) {
    %c0_i32 = arith.constant 0 : i32
    %c0_i32_0 = arith.constant 0 : i32
    %c0_i32_1 = arith.constant 0 : i32
    return %arg0, %c0_i32, %c0_i32_0 : i32, i32, i32
  }
  func.func @transform_1(%arg0: i32) -> (i32, i32, i32) {
    %c0_i32 = arith.constant 0 : i32
    %c0_i32_0 = arith.constant 0 : i32
    %c0_i32_1 = arith.constant 0 : i32
    return %arg0, %c0_i32, %c0_i32_0 : i32, i32, i32
  }
}

</mosaic_0001>

<bundles_post_ra>
// kernel: tpu_custom_call.1
= control target key start
LH: loop header
LB: loop body
LE: loop exit
PB: predicated region body
PF: predicated region fallthrough
CT: control target
= control target key end

     0   :  { %6 = vsyncpa [#allocation3], 0  ;;  %s2324_s0 = inlined_call_operand.hbm [shape: f32[2,4,36], index: 0, kind: input, shape index: {}]   ;;  %s2325_s1 = inlined_call_operand.hbm [shape: f32[2,4,36], index: 1, kind: output, shape index: {}]  }
   0x1   :  { %8 = vsyncpa [#allocation3 + $0x1], 0 }
   0x2   :  { %9 = vsyncpa [#allocation4], 0 }
   0x3   :  { %11 = vsyncpa [#allocation4 + $0x1], 0  ;;  %s2026_s6 = smov 0   ;;  %s2028_s7 = smov 0  }
   0x4   :  { %s2030_s8 = smov 0   ;;  %s2032_s9 = smov 0  }
   0x5 LB: > { %s2047_s10 = sadd.s32 4294967295, %s2010_s9   ;;  %s1650_s11 = sadd.s32 4294967294, %s2010_s9   ;;  %s2010_s9 = sphi %s2032_s9, %s2340_s9   ;;  %s2006_s8 = sphi %s2030_s8, %s2339_s8   ;;  %s2002_s7 = sphi %s2028_s7, %s2338_s7   ;;  %s1998_s6 = sphi %s2026_s6, %s2337_s6  }
   0x6   : > { %s2051_s12 = sadd.s32 1, %s2010_s9   ;;  %s24_s13 = sadd.s32 1, %s2006_s8 }
   0x7   : > { %s21_s14 = ssub.s32 %s2010_s9, %s2051_s12  ;;  %p31_p0 = scmp.ne.s32.totalorder %s2006_s8, %s2002_s7 }
   0x8   : > { %p22_p1 = scmp.eq.s32.totalorder %s21_s14, 0  ;;  %p32_p2 = scmp.eq.s32.totalorder %s2010_s9, 0 }
   0x9   : > { %p37_p3 = scmp.ne.s32.totalorder %s2002_s7, %s1998_s6  ;;  %p38_p4 = scmp.eq.s32.totalorder %s2047_s10, 0 }
   0xa   : > { %s2063_s15 = scalar_select %p22_p1, %s2006_s8, %s24_s13  }
   0xb   : > { %p2065_p5 = por %p32_p2, %p31_p0  ;;  %p2069_p6 = por %p38_p4, %p37_p3 }
   0xc   : > { %p61_p7 = scmp.eq.s32.totalorder %s2047_s10, 1  ;;  %p67_p8 = scmp.eq.s32.totalorder %s1650_s11, 1 }
   0xd   : > { %p1874_p10 = scmp.lt.s32.totalorder %s2010_s9, 2  ;;  %s87_s20 = sand.u32 1, %s2006_s8  }
   0xe   : > { %p2076_p11 = por %p61_p7, %p31_p0  ;;  %p2080_p12 = por %p67_p8, %p37_p3 }
   0xf   : > { %s1654_s21 = sshll.u32 %s2010_s9, 6  ;;  %s1653_s22 = sshll.u32 %s87_s20, 2 }
  0x10   : > { %s2329_s18 = scalar_select %p2076_p11, 1, 0 }
  0x11   : > { %s2330_s19 = scalar_select %p2080_p12, 1, 0 }
  0x12   : > { %s2089_s25 = scalar_lea.hbm %s2324_s0, %s1654_s21  ;;  %s91_s26 = scalar_lea.vmem [#allocation2], %s1653_s22 }
  0x13   : > { %s98_s27 = sshll.u32 %s91_s26, 4  ;;  %p2093_p13 = pnand %p1874_p10, %p2065_p5  ;;  %s2097_s27 = int_to_ptr.vmem [resolvable:$true] %s98_s27 }
  0x14   : > { %s88_s29 = scalar_lea.sflag [#allocation3], %s87_s20  ;;  %s1914_s30 = scalar_lea.hbm %s2089_s25, 64 }
  0x15   : > { %p1915_p2 = scmp.ne.s32.totalorder %s2089_s25, %s1914_s30  ;;  %p1916_p3 = pneg %p2093_p13 }
  0x16   : > { %s1919_s4 = scalar_lea.hbm %s2324_s0, 128  ;;  %p1920_p5 = scmp.lt.u32.totalorder %s2089_s25, %s2324_s0 }
  0x17   : > { %p1917_p4 = pnand %p1916_p3, %p1915_p2  ;;  %p1921_p8 = scmp.lt.u32.totalorder %s1919_s4, %s1914_s30 }
  0x18   : > { %p1923_p9 = scmp.lt.u32.totalorder %s1914_s30, %s2089_s25 }
  0x19   : > { %p1918_p7 = pneg %p1917_p4  ;;  %p1922_p10 = por %p1921_p8, %p1920_p5 }
  0x1b   : > { %p1924_p0 = por %p1923_p9, %p1922_p10 }
  0x1d   : > { %p1925_p1 = pnand %p1924_p0, %p1918_p7 }
  0x1f   : > { %1928 = shalt.err (!%p1925_p1)
}
  0x20   : > { %s1929_s13 = scalar_lea.vmem %s2097_s27, 64  ;;  %s2012_s14 = smov [#allocation2]  }
  0x21   : > { %p1930_p2 = scmp.ne.s32.totalorder %s2097_s27, %s1929_s13  ;;  %s1934_s16 = sshll.u32 %s2012_s14, 4  ;;  %s1935_s16 = int_to_ptr.vmem [resolvable:$false] %s1934_s16 }
  0x22   : > { %s1936_s20 = scalar_lea.vmem %s1935_s16, 128  ;;  %p1937_p11 = scmp.lt.s32.totalorder %s2097_s27, %s1935_s16 }
  0x23   : > { %p1932_p4 = pnand %p1930_p2, %p1916_p3  ;;  %p1938_p5 = scmp.lt.s32.totalorder %s1936_s20, %s1929_s13 }
  0x25   : > { %p1933_p12 = pneg %p1932_p4  ;;  %p1939_p8 = por %p1938_p5, %p1937_p11 }
  0x27   : > { %p1940_p9 = pnand %p1939_p8, %p1933_p12 }
  0x29   : > { %1943 = shalt.err (!%p1940_p9)
}
  0x2a   : > { %1869 = dma.hbm_to_vmem [thread:$0]  (!%p2093_p13), %s2089_s25, 64, %s2097_s27, %s88_s29  }
  0x2b   : > { %p2332_p0 = scmp.lt.s32.totalorder %s2010_s9, 3  ;;  %p2333_p1 = scmp.ge.s32.totalorder %s2010_s9, 1 }
  0x2d   : > { %p104_p3 = pnand %p2333_p1, %p2332_p0 }
  0x2e   : > { %s2131_s21 = sand.u32 (!%p104_p3), 1, %s2002_s7  }
  0x2f   : > { %107 = sbr.rel (%p104_p3) target bundleno = 3708 (0xe7c), region = 24  ;;  %s1656_s22 = sshll.u32 (!%p104_p3), %s2131_s21, 2 }
  0x30   : > { %s110_s23 = scalar_lea.sflag (!%p104_p3), [#allocation3], %s2131_s21  ;;  %s113_s24 = scalar_lea.vmem (!%p104_p3), [#allocation2], %s1656_s22 }
  0x36   : > { %1989 = dma.done.wait (%p2069_p6), %s110_s23, 64  }
  0x37   : > { %1991 = vsyncadd (%p2069_p6), %s110_s23, 4294967232  ;;  %vm134_vm0 = vcmask 289792   ;;  %v133_v0 = vld [vmem:[%s113_s24] sm:$0xf]  ;;  %v2013_v2 = vmov 0.0   ;;  %vm2014_vm1 = vmmov 0   ;;  %v272_v3 = vlaneseq }
  0x38   : > { %v135_v1 = vsel %vm134_vm0, %v133_v0, 0.0  ;;  %1741 = vmatprep.subr.bf16.mxu0 %v2013_v2  ;;  %1759 = vmatprep.subr.mxu1 %v2013_v2  ;;  %vm300_vm2 = vcmask 1043456   ;;  %vm296_vm4 = vcmask 31744   ;;  %vm1436_vm5 = vcmask 1041408   ;;  %s1696_s25 = sshll.u32 %s2047_s10, 6  ;;  %s131_s26 = scalar_lea.vmem [#allocation5], %s1656_s22 }
  0x39   : > { %136 = vadd.xlane.f32.xlu0 %v135_v1  ;;  %1743 = vmatprep.mubr.msk.bf16.mxu0 %vm2014_vm1, %v2013_v2  ;;  %v273_v4 = vshrl.u32 %v272_v3, 7  ;;  %v275_v5 = vand.u32 127, %v272_v3  ;;  %vm144_vm6 = vcmask 293888   ;;  %vm282_vm7 = vcmask 27648   ;;  %s1580_s27 = sshll.u32 %s131_s26, 4  ;;  %s2279_s30 = scalar_lea.hbm %s2325_s1, %s1696_s25  ;;  %s2281_s27 = int_to_ptr.vmem [resolvable:$true] %s1580_s27 }
  0x3a   : > { %1761 = vmatprep.mubr.msk.f32.mxu1 %vm2014_vm1, %v2013_v2  ;;  %s1567_s2 = scalar_lea.sflag [#allocation4], %s2131_s21  ;;  %s1944_s10 = scalar_lea.vmem %s2281_s27, 64 }
  0x3b   : > { %vm276_vm3 = vcmp.eq.s32.totalorder %v273_v4, %v275_v5  ;;  %p1945_p6 = scmp.ne.s32.totalorder %s2281_s27, %s1944_s10  ;;  %p2334_p11 = scmp.ne.s32.totalorder %s2329_s18, 0 }
  0x3c   : > { %v2149_v6 = vsel %vm276_vm3, 1.0, %v2013_v2  ;;  %s2015_s3 = smov [#allocation5]  }
  0x3d   : > { %1760 = vmatpush3.msk.msra.mxu1 %vm300_vm2, %v2149_v6  ;;  %v279_v28 = vmul.f32 1e-05, %v2149_v6  ;;  %v446_v49 = vmul.f32 1.5, %v2149_v6  ;;  %p1946_p12 = pnand %p1945_p6, %p2334_p11  ;;  %s1948_s4 = sshll.u32 %s2015_s3, 4  ;;  %s1949_s4 = int_to_ptr.vmem [resolvable:$false] %s1948_s4 }
  0x3e   : > { %1762 = vmatmul.mubr.msk.f32.vlgmr.msra.gmra.mrb[0].mxu1 %vm296_vm4, %v2149_v6  ;;  %1764 = vmatprep.subr.mxu1 %v2013_v2  ;;  %s1950_s5 = scalar_lea.vmem %s1949_s4, 128  ;;  %p1951_p7 = scmp.lt.s32.totalorder %s2281_s27, %s1949_s4 }
  0x3f   : > { %1765 = vmatpush3.msk.msra.mxu1 %vm300_vm2, %v2149_v6  ;;  %1766 = vmatprep.mubr.msk.f32.mxu1 %vm2014_vm1, %v2013_v2  ;;  %p1947_p13 = pneg %p1946_p12  ;;  %p1952_p10 = scmp.lt.s32.totalorder %s1950_s5, %s1944_s10 }
  0x40   : > { %1774 = vmatprep.subr.mxu1 %v2013_v2 }
  0x41   : > { %p1953_p2 = por %p1952_p10, %p1951_p7 }
  0x43   : > { %p1954_p4 = pnand %p1953_p2, %p1947_p13 }
  0xc6   : > { %v137_v7 = vpop.xlane.xlu0 %136 }
  0xc7   : > { %v138_v8 = vmul.f32 0.027777778, %v137_v7 }
  0xc9   : > { %v139_v9 = vsub.f32 %v133_v0, %v138_v8 }
  0xcb   : > { %v140_v10 = vpack.c.bf16 %v139_v9, %v139_v9 }
  0xcd   : > { %v141_v11 = vunpack.c.l.bf16 %v140_v10  ;;  %v2162_v12 = vsel %vm1436_vm5, %v140_v10, 0  ;;  %v146_v16 = vsel %vm144_vm6, %v140_v10, 0 }
  0xcf   : > { %v142_v13 = vsub.f32 %v139_v9, %v141_v11 }
  0xd1   : > { %v2164_v14 = vpack.c.bf16 %v142_v13, %v142_v13 }
  0xd3   : > { %v149_v15 = vsel %vm144_vm6, %v2164_v14, 0 }
  0xd4   : > { %1742 = vmatpush3.bf16.xpose.msra.mxu0 %v149_v15 }
  0xd5   : > { %1747 = vmatprep.subr.bf16.mxu0 %v2013_v2 }
  0xdb   : > { %1744 = vmatmul.mubr.msk.bf16.vlgmr.msra.gmra.mrb[0].mxu0 %vm144_vm6, %v140_v10 }
  0xdc   : > { %1748 = vmatpush3.bf16.xpose.msra.mxu0 %v146_v16  ;;  %1749 = vmatprep.mubr.msk.bf16.mxu0 %vm2014_vm1, %v2013_v2 }
  0xdd   : > { %1753 = vmatprep.subr.bf16.mxu0 %v2013_v2 }
  0xe3   : > { %1750 = vmatmul.mubr.msk.bf16.vlgmr.msra.gmra.mrb[4].mxu0 %vm144_vm6, %v140_v10 }
  0xe4   : > { %1754 = vmatpush3.bf16.xpose.msra.mxu0 %v146_v16  ;;  %1755 = vmatprep.mubr.msk.bf16.mxu0 %vm2014_vm1, %v2013_v2 }
  0xe5   : > { %1769 = vmatprep.subr.mxu0 %v2013_v2 }
  0xeb   : > { %1756 = vmatmul.mubr.msk.bf16.vlgmr.msra.gmra.mrb[8].mxu0 %vm144_vm6, %v2164_v14 }
  0xec   : > { %1771 = vmatprep.mubr.msk.f32.mxu0 %vm2014_vm1, %v2013_v2 }
 0x111   : > { %v369_v17 = vpop.f32.mrb[0].mxu1 }
 0x112   : > { %1767 = vmatmul.mubr.msk.f32.vlgmr.msra.gmra.mrb[2].mxu1 %vm296_vm4, %v369_v17  ;;  %v1763_v18 = vpop.f32.mrb[1].mxu1 }
 0x113   : > { %1776 = vmatprep.mubr.msk.f32.mxu1 %vm2014_vm1, %v2013_v2 }
 0x1ae   : > { %v185_v19 = vpop.f32.mrb[0].mxu0 }
 0x1af   : > { %v1745_v20 = vpop.f32.mrb[1].mxu0 }
 0x1b0   : > { %v188_v21 = vpop.f32.mrb[2].mxu0 }
 0x1b1   : > { %v1746_v22 = vpop.f32.mrb[3].mxu0 }
 0x1b2   : > { %v1437_v22 = vsel %vm1436_vm5, %v2164_v14, 0 }
 0x1b6   : > { %v225_v23 = vpop.f32.mrb[4].mxu0 }
 0x1b7   : > { %v226_v24 = vadd.f32 %v225_v23, %v185_v19  ;;  %v1751_v25 = vpop.f32.mrb[5].mxu0 }
 0x1b8   : > { %v228_v26 = vpop.f32.mrb[6].mxu0 }
 0x1b9   : > { %v1752_v27 = vpop.f32.mrb[7].mxu0 }
 0x1be   : > { %v265_v29 = vpop.f32.mrb[8].mxu0 }
 0x1bf   : > { %v271_v30 = vadd.f32 %v265_v29, %v226_v24  ;;  %v1757_v31 = vpop.f32.mrb[9].mxu0 }
 0x1c0   : > { %v268_v32 = vpop.f32.mrb[10].mxu0 }
 0x1c1   : > { %v280_v33 = vadd.f32 %v279_v28, %v271_v30  ;;  %v1758_v34 = vpop.f32.mrb[11].mxu0 }
 0x1c3   : > { %v281_v35 = vmul.f32 %v280_v33, %v280_v33 }
 0x1c5   : > { %v283_v36 = vsel %vm282_vm7, %v281_v35, 0.0 }
 0x1c6   : > { %284 = vadd.xlane.f32.xlu0 %v283_v36 }
 0x1e5   : > { %v442_v37 = vpop.f32.mrb[2].mxu1 }
 0x1e6   : > { %v1768_v38 = vpop.f32.mrb[3].mxu1 }
 0x253   : > { %v285_v39 = vpop.xlane.xlu0 %284 }
 0x254   : > { %v286_v40 = vrot.slane %v285_v39, 4 }
 0x256   : > { %v287_v41 = vadd.f32 %v286_v40, %v285_v39 }
 0x258   : > { %v288_v42 = vrot.slane %v287_v41, 2 }
 0x25a   : > { %v289_v43 = vadd.f32 %v288_v42, %v287_v41 }
 0x25c   : > { %v290_v44 = vrot.slane %v289_v43, 1 }
 0x25e   : > { %v291_v45 = vadd.f32 %v290_v44, %v289_v43 }
 0x260   : > { %1860 = vpush %v291_v45 }
 0x291   : > { %s1861_s17 = spop %1860 }
 0x292   : > { %v293_v46 = vstv %s1861_s17 }
 0x293   : > { %1910 = vrsqrt.f32 %v293_v46 }
 0x29d   : > { %v2181_v47 = vpop.eup %1910 }
 0x29e   : > { %v2184_v48 = vmul.f32 %v2181_v47, %v280_v33  ;;  %1912 = vrsqrt.f32 %v2181_v47  ;;  %vm1423_vm8 = vcmp.eq.f32.partialorder %v2181_v47, inf  ;;  %v1426_v31 = vand.u32 2147483648, %v2181_v47 }
 0x29f   : > { %vm1425_vm9 = vcmp.eq.f32.partialorder %v2181_v47, 0.0 }
 0x2a0   : > { %1770 = vmatpush3.msk.msra.mxu0 %vm300_vm2, %v2184_v48 }
 0x2a1   : > { %1772 = vmatmul.mubr.msk.f32.vlgmr.msra.gmra.mrb[12].mxu0 %vm296_vm4, %v442_v37  ;;  %1779 = vmatprep.subr.mxu0 %v2013_v2 }
 0x2a2   : > { %1781 = vmatprep.mubr.msk.f32.mxu0 %vm2014_vm1, %v2013_v2 }
 0x2a8   : > { %v1913_v25 = vpop.eup %1912 }
 0x2a9   : > { %v1422_v26 = vmul.f32 %v1913_v25, %v2181_v47 }
 0x2ab   : > { %v1424_v29 = vsel %vm1423_vm8, %v2181_v47, %v1422_v26 }
 0x2ac   : > { %v1427_v33 = vsel %vm1425_vm9, %v1426_v31, %v1424_v29 }
 0x374   : > { %v519_v50 = vpop.f32.mrb[12].mxu0 }
 0x375   : > { %v523_v51 = vmul.f32 0.5, %v519_v50  ;;  %v1773_v52 = vpop.f32.mrb[13].mxu0 }
 0x377   : > { %v524_v53 = vsub.f32 %v446_v49, %v523_v51 }
 0x379   : > { %1775 = vmatpush3.msk.msra.mxu1 %vm300_vm2, %v524_v53  ;;  %1780 = vmatpush3.msk.msra.mxu0 %vm300_vm2, %v524_v53  ;;  %v673_v59 = vmul.f32 1.5, %v524_v53 }
 0x37a   : > { %1777 = vmatmul.mubr.msk.f32.vlgmr.msra.gmra.mrb[4].mxu1 %vm296_vm4, %v524_v53  ;;  %1784 = vmatprep.subr.mxu1 %v2013_v2 }
 0x37b   : > { %1785 = vmatpush3.msk.msra.mxu1 %vm300_vm2, %v2184_v48  ;;  %1786 = vmatprep.mubr.msk.f32.mxu1 %vm2014_vm1, %v2013_v2 }
 0x37c   : > { %1789 = vmatprep.subr.mxu0 %v2013_v2  ;;  %1794 = vmatprep.subr.mxu1 %v2013_v2 }
 0x44d   : > { %v596_v54 = vpop.f32.mrb[4].mxu1 }
 0x44e   : > { %1782 = vmatmul.mubr.msk.f32.vlgmr.msra.gmra.mrb[14].mxu0 %vm296_vm4, %v596_v54  ;;  %v1778_v55 = vpop.f32.mrb[5].mxu1 }
 0x44f   : > { %1791 = vmatprep.mubr.msk.f32.mxu0 %vm2014_vm1, %v2013_v2 }
 0x521   : > { %v669_v56 = vpop.f32.mrb[14].mxu0 }
 0x522   : > { %1787 = vmatmul.mubr.msk.f32.vlgmr.msra.gmra.mrb[6].mxu1 %vm296_vm4, %v669_v56  ;;  %v1783_v57 = vpop.f32.mrb[15].mxu0 }
 0x523   : > { %1796 = vmatprep.mubr.msk.f32.mxu1 %vm2014_vm1, %v2013_v2 }
 0x5f5   : > { %v743_v58 = vpop.f32.mrb[6].mxu1 }
 0x5f6   : > { %v747_v60 = vmul.f32 0.5, %v743_v58  ;;  %v1788_v61 = vpop.f32.mrb[7].mxu1 }
 0x5f8   : > { %v748_v62 = vsub.f32 %v673_v59, %v747_v60 }
 0x5fa   : > { %1790 = vmatpush3.msk.msra.mxu0 %vm300_vm2, %v748_v62  ;;  %1795 = vmatpush3.msk.msra.mxu1 %vm300_vm2, %v748_v62  ;;  %v897_v5 = vmul.f32 1.5, %v748_v62 }
 0x5fb   : > { %1792 = vmatmul.mubr.msk.f32.vlgmr.msra.gmra.mrb[16].mxu0 %vm296_vm4, %v748_v62  ;;  %1799 = vmatprep.subr.mxu0 %v2013_v2 }
 0x5fc   : > { %1800 = vmatpush3.msk.msra.mxu0 %vm300_vm2, %v2184_v48  ;;  %1801 = vmatprep.mubr.msk.f32.mxu0 %vm2014_vm1, %v2013_v2 }
 0x5fd   : > { %1804 = vmatprep.subr.mxu1 %v2013_v2  ;;  %1809 = vmatprep.subr.mxu0 %v2013_v2 }
 0x6ce   : > { %v820_v63 = vpop.f32.mrb[16].mxu0 }
 0x6cf   : > { %v1793_v0 = vpop.f32.mrb[17].mxu0  ;;  %1797 = vmatmul.mubr.msk.f32.vlgmr.msra.gmra.mrb[8].mxu1 %vm296_vm4, %v820_v63 }
 0x6d0   : > { %1806 = vmatprep.mubr.msk.f32.mxu1 %vm2014_vm1, %v2013_v2 }
 0x7a2   : > { %v893_v1 = vpop.f32.mrb[8].mxu1 }
 0x7a3   : > { %v1798_v3 = vpop.f32.mrb[9].mxu1  ;;  %1802 = vmatmul.mubr.msk.f32.vlgmr.msra.gmra.mrb[18].mxu0 %vm296_vm4, %v893_v1 }
 0x7a4   : > { %1811 = vmatprep.mubr.msk.f32.mxu0 %vm2014_vm1, %v2013_v2 }
 0x876   : > { %v967_v4 = vpop.f32.mrb[18].mxu0 }
 0x877   : > { %v971_v6 = vmul.f32 0.5, %v967_v4  ;;  %v1803_v7 = vpop.f32.mrb[19].mxu0 }
 0x879   : > { %v972_v8 = vsub.f32 %v897_v5, %v971_v6 }
 0x87b   : > { %1805 = vmatpush3.msk.msra.mxu1 %vm300_vm2, %v972_v8  ;;  %1810 = vmatpush3.msk.msra.mxu0 %vm300_vm2, %v972_v8  ;;  %v1121_v16 = vmul.f32 1.5, %v972_v8 }
 0x87c   : > { %1807 = vmatmul.mubr.msk.f32.vlgmr.msra.gmra.mrb[10].mxu1 %vm296_vm4, %v972_v8  ;;  %1814 = vmatprep.subr.mxu1 %v2013_v2 }
 0x87d   : > { %1815 = vmatpush3.msk.msra.mxu1 %vm300_vm2, %v2184_v48  ;;  %1816 = vmatprep.mubr.msk.f32.mxu1 %vm2014_vm1, %v2013_v2 }
 0x87e   : > { %1819 = vmatprep.subr.mxu0 %v2013_v2  ;;  %1824 = vmatprep.subr.mxu1 %v2013_v2 }
 0x94f   : > { %v1044_v9 = vpop.f32.mrb[10].mxu1 }
 0x950   : > { %v1808_v10 = vpop.f32.mrb[11].mxu1  ;;  %1812 = vmatmul.mubr.msk.f32.vlgmr.msra.gmra.mrb[20].mxu0 %vm296_vm4, %v1044_v9 }
 0x951   : > { %1821 = vmatprep.mubr.msk.f32.mxu0 %vm2014_vm1, %v2013_v2 }
 0xa23   : > { %v1117_v11 = vpop.f32.mrb[20].mxu0 }
 0xa24   : > { %v1813_v13 = vpop.f32.mrb[21].mxu0  ;;  %1817 = vmatmul.mubr.msk.f32.vlgmr.msra.gmra.mrb[12].mxu1 %vm296_vm4, %v1117_v11 }
 0xa25   : > { %1826 = vmatprep.mubr.msk.f32.mxu1 %vm2014_vm1, %v2013_v2 }
 0xaf7   : > { %v1191_v15 = vpop.f32.mrb[12].mxu1 }
 0xaf8   : > { %v1195_v17 = vmul.f32 0.5, %v1191_v15  ;;  %v1818_v18 = vpop.f32.mrb[13].mxu1 }
 0xafa   : > { %v1196_v19 = vsub.f32 %v1121_v16, %v1195_v17 }
 0xafc   : > { %1820 = vmatpush3.msk.msra.mxu0 %vm300_vm2, %v1196_v19  ;;  %1825 = vmatpush3.msk.msra.mxu1 %vm300_vm2, %v1196_v19  ;;  %v1345_v28 = vmul.f32 1.5, %v1196_v19 }
 0xafd   : > { %1822 = vmatmul.mubr.msk.f32.vlgmr.msra.gmra.mrb[22].mxu0 %vm296_vm4, %v1196_v19  ;;  %1829 = vmatprep.subr.mxu0 %v2013_v2 }
 0xafe   : > { %1830 = vmatpush3.msk.msra.mxu0 %vm300_vm2, %v2184_v48  ;;  %1834 = vmatprep.subr.bf16.mxu1 %v2013_v2 }
 0xaff   : > { %1831 = vmatprep.mubr.msk.f32.mxu0 %vm2014_vm1, %v2013_v2 }
 0xbd0   : > { %v1268_v20 = vpop.f32.mrb[22].mxu0 }
 0xbd1   : > { %v1823_v21 = vpop.f32.mrb[23].mxu0  ;;  %1827 = vmatmul.mubr.msk.f32.vlgmr.msra.gmra.mrb[14].mxu1 %vm296_vm4, %v1268_v20 }
 0xbd2   : > { %1835 = vmatpush3.bf16.msra.mxu1 %v1437_v22  ;;  %1836 = vmatprep.mubr.msk.bf16.mxu1 %vm2014_vm1, %v2013_v2 }
 0xbd3   : > { %1840 = vmatprep.subr.bf16.mxu1 %v2013_v2 }
 0xca4   : > { %v1341_v23 = vpop.f32.mrb[14].mxu1 }
 0xca5   : > { %v1828_v24 = vpop.f32.mrb[15].mxu1  ;;  %1832 = vmatmul.mubr.msk.f32.vlgmr.msra.gmra.mrb[24].mxu0 %vm296_vm4, %v1341_v23 }
 0xd78   : > { %v1415_v27 = vpop.f32.mrb[24].mxu0 }
 0xd79   : > { %v1419_v14 = vmul.f32 0.5, %v1415_v27  ;;  %v1833_v30 = vpop.f32.mrb[25].mxu0 }
 0xd7b   : > { %v1420_v32 = vsub.f32 %v1345_v28, %v1419_v14 }
 0xd7d   : > { %v1428_v34 = vmul.f32 %v1427_v33, %v1420_v32 }
 0xd7f   : > { %v1429_v35 = vpack.c.bf16 %v1428_v34, %v1428_v34 }
 0xd81   : > { %1837 = vmatmul.mubr.msk.bf16.vlgmr.msra.gmra.mrb[16].mxu1 %vm296_vm4, %v1429_v35  ;;  %v1430_v36 = vunpack.c.l.bf16 %v1429_v35 }
 0xd82   : > { %1841 = vmatpush3.bf16.msra.mxu1 %v2162_v12  ;;  %1842 = vmatprep.mubr.msk.bf16.mxu1 %vm2014_vm1, %v2013_v2 }
 0xd83   : > { %1846 = vmatprep.subr.bf16.mxu1 %v2013_v2  ;;  %v1431_v37 = vsub.f32 %v1428_v34, %v1430_v36 }
 0xd85   : > { %v1432_v38 = vpack.c.bf16 %v1431_v37, %v1431_v37 }
 0xd8d   : > { %1843 = vmatmul.mubr.msk.bf16.vlgmr.msra.gmra.mrb[16].mxu1 %vm296_vm4, %v1429_v35 }
 0xd8e   : > { %1847 = vmatpush3.bf16.msra.mxu1 %v2162_v12  ;;  %1848 = vmatprep.mubr.msk.bf16.mxu1 %vm2014_vm1, %v2013_v2 }
 0xd99   : > { %1849 = vmatmul.mubr.msk.bf16.vlgmr.msra.gmra.mrb[16].mxu1 %vm296_vm4, %v1432_v38 }
 0xe6c   : > { %v1558_v2 = vpop.f32.mrb[16].mxu1 }
 0xe6d   : > { %1565 = vst.msk [vmem:[%s131_s26] sm:$0xf] %vm134_vm0, %v1558_v2  ;;  %v1850_v12 = vpop.f32.mrb[17].mxu1 }
 0xe6e   : > { %v1561_v39 = vpop.f32.mrb[18].mxu1 }
 0xe6f   : > { %1957 = shalt.err (!%p1954_p4)
}
 0xe70   : > { %s1958_s11 = scalar_lea.hbm %s2279_s30, 64  ;;  %s1962_s16 = scalar_lea.hbm %s2325_s1, 128 }
 0xe71   : > { %p1959_p5 = scmp.ne.s32.totalorder %s2279_s30, %s1958_s11  ;;  %p1963_p0 = scmp.lt.u32.totalorder %s2279_s30, %s2325_s1 }
 0xe72   : > { %p1964_p1 = scmp.lt.u32.totalorder %s1962_s16, %s1958_s11  ;;  %p1966_p6 = scmp.lt.u32.totalorder %s1958_s11, %s2279_s30 }
 0xe73   : > { %p1960_p8 = pnand %p1959_p5, %p2334_p11 }
 0xe74   : > { %p1965_p3 = por %p1964_p1, %p1963_p0 }
 0xe75   : > { %p1961_p9 = pneg %p1960_p8 }
 0xe76   : > { %p1967_p12 = por %p1966_p6, %p1965_p3 }
 0xe78   : > { %p1968_p13 = pnand %p1967_p12, %p1961_p9 }
 0xe7a   : > { %1971 = shalt.err (!%p1968_p13)
}
 0xe7b   : > { %1864 = dma.vmem_to_hbm [thread:$0]  (%p2334_p11), %s2281_s27, 64, %s2279_s30, %s1567_s2   ;;  %v1851_v40 = vpop.f32.mrb[19].mxu1 }
 0xe7c PF: > { %s1592_s22 = sand.u32 1, %s1998_s6   ;;  %p2335_p7 = scmp.ne.s32.totalorder %s2330_s19, 0 }
 0xe7d   : > { %p2336_p10 = scmp.ge.s32.totalorder %s2010_s9, 2  ;;  %s1593_s23 = scalar_lea.sflag [#allocation4], %s1592_s22 }
 0xe7f   : > { %p1871_p2 = pnand %p2336_p10, %p2335_p7 }
 0xe81   : > { %1993 = dma.done.wait (!%p1871_p2), %s1593_s23, 64  }
 0xe82   : > { %1995 = vsyncadd (!%p1871_p2), %s1593_s23, 4294967232  ;;  %p14_p4 = scmp.ge.s32.totalorder %s2051_s12, 4   ;;  %s2337_s6 = smov %s2002_s7 }
 0xe83   : > { %s2338_s7 = smov %s2006_s8  ;;  %s2339_s8 = smov %s2063_s15 }
 0xe84   : > { %s2340_s9 = smov %s2051_s12  ;;  %16 = sbr.rel (!%p14_p4) target bundleno = 5 (0x5), region = 69 }
 0xe8b   :  { %1598 = vsyncpa [#allocation3], 1 }
 0xe8c   :  { %1600 = vsyncpa [#allocation3 + $0x1], 1 }
 0xe8d   :  { %1601 = vsyncpa [#allocation4], 1 }
 0xe8e   :  { %1603 = vsyncpa [#allocation4 + $0x1], 1 }

</bundles_post_ra>
